<compile_context>
chip_gen: v7x
topology: tpu7x:2x2x1
jax: 0.10.0
libtpu: 0.0.40
codegen_flags: <defaults>
</compile_context>

<pallas_src>
import jax
import jax.numpy as jnp
from jax.experimental import pallas as pl
from jax.experimental.pallas import tpu as pltpu

IN_FEATURES = 32 * 32   # 1024
OUT_FEATURES = 10
N_PAD = 128             # lane-padded logits width (VMEM/MXU only; HBM out stays 10)
_NEG_BIG = -1e30        # padded-column bias -> exp underflows to exactly 0


def _fc_logsoftmax_kernel(x_ref, w_ref, b_ref, o_ref):
    # x: (TB, 1024) in the caller's dtype (no in-kernel cast),
    # w: (1024, 128) in x's dtype, b: (1, 128) f32, o: (TB, 10) f32.
    logits = jnp.dot(x_ref[...], w_ref[...],
                     preferred_element_type=jnp.float32)
    logits = logits + b_ref[...]              # padded columns land at ~-1e30
    # Numerically stable log_softmax over the (lane-dense) last axis; padded
    # columns contribute exp(-huge) == 0 to the sum and never win the max.
    m = jnp.max(logits, axis=-1, keepdims=True)
    shifted = logits - m
    lse = jnp.log(jnp.sum(jnp.exp(shifted), axis=-1, keepdims=True))
    o_ref[...] = (shifted[:, :OUT_FEATURES] - lse).astype(o_ref.dtype)


def dnn_v3_forward(x, w, b, *, tb=None):
    """x: any shape whose trailing elements flatten to multiples of 1024
    (e.g. (B, 1, 32, 32)); f32 or bf16 (bf16 halves HBM read traffic).
    w: (1024, 10), b: (10,). Returns (B, 10) f32 log-probabilities."""
    x2d = x.reshape(-1, IN_FEATURES)   # no dtype cast here: keep HBM bytes minimal
    B = x2d.shape[0]
    itemsize = x2d.dtype.itemsize

    if tb is None:
        # ~4 MiB activation block (double-buffered ~8 MiB): safe under the
        # v5e 16 MiB scoped default, roomy on v6e/v7x, and large enough to
        # amortize the ~0.35 us/step pipeline overhead.
        tb = 2048 if itemsize <= 2 else 1024

    TB = min(tb, B)
    n_steps = pl.cdiv(B, TB)
    if 1 < n_steps < 4:
        # Keep >= 4 grid steps so both v7x TensorCores get work and the DMA
        # pipeline overlaps; keep the tile a multiple of 8 (sublane rule).
        TB = max(8, (pl.cdiv(B, 4) // 8) * 8)
        n_steps = pl.cdiv(B, TB)
    grid = (n_steps,)

    # Weight in the activation dtype (bf16 x bf16 -> f32 is the MXU native
    # path; f32 stays f32) and lane-padded to 128 output columns. Bias stays
    # f32 (added to f32 logits); padded bias columns are -1e30.
    w_pad = (
        jnp.zeros((IN_FEATURES, N_PAD), jnp.float32)
        .at[:, :OUT_FEATURES].set(w.astype(jnp.float32))
        .astype(x2d.dtype)
    )
    b_pad = (
        jnp.full((1, N_PAD), _NEG_BIG, jnp.float32)
        .at[0, :OUT_FEATURES].set(b.astype(jnp.float32))
    )

    # Raise the scoped-VMEM limit only when a large TB actually needs it;
    # cap well under v7x's 64 MiB/TC so double-buffering always fits.
    act_block = TB * IN_FEATURES * itemsize
    out_block = TB * OUT_FEATURES * 4
    resident = IN_FEATURES * N_PAD * w_pad.dtype.itemsize + N_PAD * 4
    vmem_need = 2 * act_block + 2 * out_block + resident + (1 << 20)
    vmem_limit = int(min(vmem_need, 48 << 20)) if vmem_need > (14 << 20) else None

    cost = pl.CostEstimate(
        flops=2 * B * IN_FEATURES * N_PAD,
        transcendentals=B * (N_PAD + 1),          # exps + per-row log
        bytes_accessed=(
            B * IN_FEATURES * itemsize
            + IN_FEATURES * N_PAD * w_pad.dtype.itemsize
            + N_PAD * 4
            + B * OUT_FEATURES * 4
        ),
    )

    return pl.pallas_call(
        _fc_logsoftmax_kernel,
        out_shape=jax.ShapeDtypeStruct((B, OUT_FEATURES), jnp.float32),
        grid_spec=pltpu.PrefetchScalarGridSpec(
            num_scalar_prefetch=0,
            grid=grid,
            in_specs=[
                # Activation streams block-by-block along the batch axis.
                # (If xprof shows DMA gaps at step boundaries, try
                #  pipeline_mode=pl.Buffered(3) here - VMEM headroom exists.)
                pl.BlockSpec((TB, IN_FEATURES), lambda i: (i, 0)),
                # Weight (<=512 KiB) and bias stay resident (constant map).
                pl.BlockSpec((IN_FEATURES, N_PAD), lambda i: (0, 0)),
                pl.BlockSpec((1, N_PAD), lambda i: (0, 0)),
            ],
            out_specs=pl.BlockSpec((TB, OUT_FEATURES), lambda i: (i, 0)),
        ),
        compiler_params=pltpu.CompilerParams(
            # True data-parallel axis: lets v7x shard the grid over both TCs;
            # neutral on single-TC v5e/v6e.
            dimension_semantics=("parallel",),
            vmem_limit_bytes=vmem_limit,
        ),
        cost_estimate=cost,
    )(x2d, w_pad, b_pad)


def init_params(key):
    # Match torch nn.Linear(1024, 10) default init:
    # U(-1/sqrt(fan_in), 1/sqrt(fan_in)); stored as (in, out) = W^T.
    bound = 1.0 / (IN_FEATURES ** 0.5)
    kw, kb = jax.random.split(key)
    w = jax.random.uniform(
        kw, (IN_FEATURES, OUT_FEATURES), jnp.float32, -bound, bound
    )
    b = jax.random.uniform(kb, (OUT_FEATURES,), jnp.float32, -bound, bound)
    return w, b


def _reference(x, w, b):
    x2d = x.reshape(-1, IN_FEATURES).astype(jnp.float32)
    logits = x2d @ w.astype(jnp.float32) + b.astype(jnp.float32)[None, :]
    return jax.nn.log_softmax(logits, axis=-1)


if __name__ == "__main__":
    key = jax.random.PRNGKey(0)
    k_x, k_x2, k_p = jax.random.split(key, 3)
    w, b = init_params(k_p)

    # Small example consistent with the forward: batch=2, single channel 32x32.
    x = jax.random.normal(k_x, (2, 1, 32, 32), jnp.float32)
    out = jax.block_until_ready(dnn_v3_forward(x, w, b))
    assert out.shape == (2, OUT_FEATURES)
    row_sums = jnp.exp(out).sum(axis=-1)
    assert bool(jnp.allclose(row_sums, 1.0, atol=1e-5))
    assert bool(jnp.allclose(out, _reference(x, w, b), atol=1e-5, rtol=1e-5))

    # bf16 activation path (half the HBM read traffic; MXU-native operands).
    x_bf = x.astype(jnp.bfloat16)
    out_bf = jax.block_until_ready(dnn_v3_forward(x_bf, w, b))
    assert out_bf.shape == (2, OUT_FEATURES)
    assert bool(jnp.allclose(out_bf, _reference(x_bf, w, b), atol=2e-2))

    # Ragged-batch check: B=20 with tb=8 exercises a partial last block
    # (padded rows compute garbage but are never written back).
    x_rag = jax.random.normal(k_x2, (20, 1, 32, 32), jnp.float32)
    out_rag = jax.block_until_ready(dnn_v3_forward(x_rag, w, b, tb=8))
    assert out_rag.shape == (20, OUT_FEATURES)
    assert bool(
        jnp.allclose(out_rag, _reference(x_rag, w, b), atol=1e-5, rtol=1e-5)
    )

    print("KERNEL_OK")
</pallas_src>

<mosaic_0001>
module attributes {stable_mosaic.version = 11 : i64} {
  func.func @_fc_logsoftmax_kernel(%arg0: i32, %arg1: memref<2x1024xf32, #tpu.memory_space<vmem>>, %arg2: memref<1024x128xf32, #tpu.memory_space<vmem>>, %arg3: memref<1x128xf32, #tpu.memory_space<vmem>>, %arg4: memref<2x10xf32, #tpu.memory_space<vmem>>) attributes {dimension_semantics = [#tpu.dimension_semantics<parallel>], iteration_bounds = array<i64: 1>, scalar_prefetch = 0 : i64, scratch_operands = 0 : i64, tpu.core_type = #tpu.core_type<tc>, window_params = [{transform_indices = @transform_0, window_bounds = array<i64: 2, 1024>}, {pipeline_mode = #tpu.pipeline_mode<synchronous>, transform_indices = @transform_1, window_bounds = array<i64: 1024, 128>}, {pipeline_mode = #tpu.pipeline_mode<synchronous>, transform_indices = @transform_2, window_bounds = array<i64: 1, 128>}, {transform_indices = @transform_3, window_bounds = array<i64: 2, 10>}]} {
    %c0 = arith.constant 0 : index
    %c0_0 = arith.constant 0 : index
    %0 = vector.load %arg1[%c0, %c0_0] : memref<2x1024xf32, #tpu.memory_space<vmem>>, vector<2x1024xf32>
    %c0_1 = arith.constant 0 : index
    %c0_2 = arith.constant 0 : index
    %1 = vector.load %arg2[%c0_1, %c0_2] : memref<1024x128xf32, #tpu.memory_space<vmem>>, vector<1024x128xf32>
    %cst = arith.constant dense<0.000000e+00> : vector<2x128xf32>
    %2 = tpu.matmul %0, %1, %cst {dimension_numbers = #tpu.dot_dimension_numbers<[1], [0], [0], [1], [0, 0, 1, 1], [], []>} : vector<2x1024xf32>, vector<1024x128xf32>, vector<2x128xf32> -> vector<2x128xf32>
    %c0_3 = arith.constant 0 : index
    %c0_4 = arith.constant 0 : index
    %3 = vector.load %arg3[%c0_3, %c0_4] : memref<1x128xf32, #tpu.memory_space<vmem>>, vector<1x128xf32>
    %4 = vector.broadcast %3 : vector<1x128xf32> to vector<2x128xf32>
    %5 = arith.addf %2, %4 : vector<2x128xf32>
    %cst_5 = arith.constant dense<0xFF800000> : vector<2xf32>
    %6 = vector.multi_reduction <maximumf>, %5, %cst_5 [1] : vector<2x128xf32> to vector<2xf32>
    %7 = vector.shape_cast %6 : vector<2xf32> to vector<2x1xf32>
    %8 = vector.broadcast %7 : vector<2x1xf32> to vector<2x128xf32>
    %9 = arith.subf %5, %8 : vector<2x128xf32>
    %10 = math.exp %9 : vector<2x128xf32>
    %cst_6 = arith.constant dense<0.000000e+00> : vector<2xf32>
    %11 = vector.multi_reduction <add>, %10, %cst_6 [1] : vector<2x128xf32> to vector<2xf32>
    %12 = vector.shape_cast %11 : vector<2xf32> to vector<2x1xf32>
    %13 = math.log %12 : vector<2x1xf32>
    %14 = vector.extract_strided_slice %9 {offsets = [0, 0], sizes = [2, 10], strides = [1, 1]} : vector<2x128xf32> to vector<2x10xf32>
    %15 = vector.broadcast %13 : vector<2x1xf32> to vector<2x10xf32>
    %16 = arith.subf %14, %15 : vector<2x10xf32>
    %c0_7 = arith.constant 0 : index
    %c0_8 = arith.constant 0 : index
    %17 = vector.load %arg4[%c0_7, %c0_8] : memref<2x10xf32, #tpu.memory_space<vmem>>, vector<2x10xf32>
    tpu.vector_store %arg4[%c0_7, %c0_8], %16 {strides = array<i32>} : memref<2x10xf32, #tpu.memory_space<vmem>>, vector<2x10xf32>,
    return
  }
  func.func @transform_0(%arg0: i32) -> (i32, i32) {
    %c0_i32 = arith.constant 0 : i32
    %c0_i32_0 = arith.constant 0 : i32
    return %arg0, %c0_i32 : i32, i32
  }
  func.func @transform_1(%arg0: i32) -> (i32, i32) {
    %c0_i32 = arith.constant 0 : i32
    %c0_i32_0 = arith.constant 0 : i32
    %c0_i32_1 = arith.constant 0 : i32
    return %c0_i32, %c0_i32_0 : i32, i32
  }
  func.func @transform_2(%arg0: i32) -> (i32, i32) {
    %c0_i32 = arith.constant 0 : i32
    %c0_i32_0 = arith.constant 0 : i32
    %c0_i32_1 = arith.constant 0 : i32
    return %c0_i32, %c0_i32_0 : i32, i32
  }
  func.func @transform_3(%arg0: i32) -> (i32, i32) {
    %c0_i32 = arith.constant 0 : i32
    %c0_i32_0 = arith.constant 0 : i32
    return %arg0, %c0_i32 : i32, i32
  }
}

</mosaic_0001>

<bundles_post_ra>
// kernel: tpu_custom_call.1
= control target key start
LH: loop header
LB: loop body
LE: loop exit
PB: predicated region body
PF: predicated region fallthrough
CT: control target
= control target key end

     0   :  { %8 = vsyncpa [#allocation3], 0  ;;  %s969_s0 = inlined_call_operand.hbm [shape: f32[2,1024], index: 0, kind: input, shape index: {}]   ;;  %s970_s1 = inlined_call_operand.hbm [shape: f32[1024,128], index: 1, kind: input, shape index: {}]   ;;  %s971_s2 = inlined_call_operand.vmem [shape: f32[1,128], index: 2, kind: input, shape index: {}]   ;;  %s972_s3 = inlined_call_operand.hbm [shape: f32[2,10], index: 3, kind: output, shape index: {}]  }
   0x1   :  { %9 = vsyncpa [#allocation6], 0 }
   0x2   :  { %10 = vsyncpa [#allocation4], 0  ;;  %s886_s12 = smov [#allocation2]   ;;  %s887_s14 = smov [#allocation5]  }
   0x3   :  { %s17_s13 = sshll.u32 %s886_s12, 4  ;;  %s26_s15 = sshll.u32 %s887_s14, 4  ;;  %s18_s13 = int_to_ptr.vmem [resolvable:$true] %s17_s13  ;;  %s912_s15 = int_to_ptr.vmem [resolvable:$true] %s26_s15 }
   0x4   :  { %s814_s18 = scalar_lea.hbm %s969_s0, 256 }
   0x5   :  { %p815_p0 = scmp.ne.s32.totalorder %s969_s0, %s814_s18  ;;  %p818_p1 = scmp.lt.u32.totalorder %s814_s18, %s969_s0 }
   0x7   :  { %p820_p2 = pnand %p818_p1, %p815_p0 }
   0x9   :  { %823 = shalt.err (!%p820_p2)
}
   0xa   :  { %s824_s23 = scalar_lea.vmem %s18_s13, 256  ;;  %p829_p4 = scmp.lt.s32.totalorder %s18_s13, %s18_s13 }
   0xb   :  { %p825_p3 = scmp.ne.s32.totalorder %s18_s13, %s824_s23  ;;  %p830_p5 = scmp.lt.s32.totalorder %s824_s23, %s824_s23 }
   0xd   :  { %p831_p6 = por %p830_p5, %p829_p4 }
   0xf   :  { %p832_p7 = pnand %p831_p6, %p825_p3 }
  0x11   :  { %835 = shalt.err (!%p832_p7)
}
  0x12   :  { %20 = dma.hbm_to_vmem [thread:$0]  %s969_s0, 256, %s18_s13, [#allocation3]  }
  0x13   :  { %s836_s28 = scalar_lea.hbm %s970_s1, 16384 }
  0x14   :  { %p837_p8 = scmp.ne.s32.totalorder %s970_s1, %s836_s28  ;;  %p840_p9 = scmp.lt.u32.totalorder %s836_s28, %s970_s1 }
  0x16   :  { %p842_p10 = pnand %p840_p9, %p837_p8 }
  0x18   :  { %845 = shalt.err (!%p842_p10)
}
  0x19   :  { %s846_s6 = scalar_lea.vmem %s912_s15, 16384  ;;  %p851_p12 = scmp.lt.s32.totalorder %s912_s15, %s912_s15 }
  0x1a   :  { %p847_p11 = scmp.ne.s32.totalorder %s912_s15, %s846_s6  ;;  %p852_p13 = scmp.lt.s32.totalorder %s846_s6, %s846_s6 }
  0x1c   :  { %p853_p0 = por %p852_p13, %p851_p12 }
  0x1e   :  { %p854_p1 = pnand %p853_p0, %p847_p11 }
  0x20   :  { %857 = shalt.err (!%p854_p1)
}
  0x21   :  { %s888_s0 = smov 128   ;;  %s889_s7 = smov 8  }
  0x22   :  { %32 = dma.hbm_to_vmem [thread:$0]  %s970_s1, 16384, %s912_s15, [#allocation6], %s888_s0, %s888_s0, %s889_s7  }
  0x23   :  { %880 = dma.done.wait [#allocation3], 256  }
  0x24   :  { %881 = vsyncadd [#allocation3], 4294967040 }
  0x25   :  { %882 = dma.done.wait [#allocation6], 16384  }
  0x26   :  { %883 = vsyncadd [#allocation6], 4294950912  ;;  %v59_v0 = vld [vmem:[#allocation5 + $0x80] sm:$0xff]  ;;  %v60_v1 = vld [vmem:[#allocation5 + $0x88] sm:$0xff]  ;;  %v890_v47 = vmov 1983009808   ;;  %v184_v49 = vlaneseq }
  0x27   :  { %v43_v2 = vld [vmem:[#allocation5] sm:$0xff]  ;;  %v674_v3 = vpack.c.bf16 %v60_v1, %v59_v0  ;;  %v44_v4 = vld [vmem:[#allocation5 + $0x8] sm:$0xff]  ;;  %v61_v11 = vld [vmem:[#allocation5 + $0x90] sm:$0xff]  ;;  %v182_v48 = vunpack.c.l.s4 %v890_v47  ;;  %vm502_vm0 = vcmask 1041408   ;;  %vm515_vm1 = vcmask 74752  }
  0x28   :  { %v91_v5 = vld [vmem:[#allocation5 + $0x180] sm:$0xff]  ;;  %v92_v6 = vld [vmem:[#allocation5 + $0x188] sm:$0xff]  ;;  %v676_v7 = vpack.c.bf16 %v44_v4, %v43_v2  ;;  %v62_v13 = vld [vmem:[#allocation5 + $0x98] sm:$0xff]  ;;  %v185_v0 = vshrl.u32 %v184_v49, 7 }
  0x29   :  { %v706_v8 = vpack.c.bf16 %v92_v6, %v91_v5  ;;  %v75_v9 = vld [vmem:[#allocation5 + $0x100] sm:$0xff]  ;;  %v76_v10 = vld [vmem:[#allocation5 + $0x108] sm:$0xff]  ;;  %675 = vmatprep.subr.bf16.mxu0 %v674_v3  ;;  %v45_v14 = vld [vmem:[#allocation5 + $0x10] sm:$0xff]  ;;  %v678_v16 = vpack.c.bf16 %v62_v13, %v61_v11  ;;  %v183_v63 = vunpack.c.0.s8 %v182_v48 }
  0x2a   :  { %v708_v12 = vpack.c.bf16 %v76_v10, %v75_v9  ;;  %v46_v15 = vld [vmem:[#allocation5 + $0x18] sm:$0xff]  ;;  %677 = vmatpush3.bf16.msra.mxu0 %v676_v7  ;;  %v93_v18 = vld [vmem:[#allocation5 + $0x190] sm:$0xff]  ;;  %v63_v23 = vld [vmem:[#allocation5 + $0xa0] sm:$0xff] }
  0x2b   :  { %707 = vmatprep.subr.bf16.mxu1 %v706_v8  ;;  %v680_v17 = vpack.c.bf16 %v46_v15, %v45_v14  ;;  %v94_v19 = vld [vmem:[#allocation5 + $0x198] sm:$0xff]  ;;  %v77_v20 = vld [vmem:[#allocation5 + $0x110] sm:$0xff]  ;;  %v64_v24 = vld [vmem:[#allocation5 + $0xa8] sm:$0xff]  ;;  %679 = vmatprep.subr.bf16.mxu0 %v678_v16  ;;  %v943_v13 = vsub.s32 %v183_v63, %v185_v0 }
  0x2c   :  { %709 = vmatpush3.bf16.msra.mxu1 %v708_v12  ;;  %v710_v21 = vpack.c.bf16 %v94_v19, %v93_v18  ;;  %v78_v22 = vld [vmem:[#allocation5 + $0x118] sm:$0xff]  ;;  %v682_v26 = vpack.c.bf16 %v64_v24, %v63_v23  ;;  %v47_v27 = vld [vmem:[#allocation5 + $0x20] sm:$0xff]  ;;  %v48_v28 = vld [vmem:[#allocation5 + $0x28] sm:$0xff] }
  0x2d   :  { %v712_v25 = vpack.c.bf16 %v78_v22, %v77_v20  ;;  %v95_v29 = vld [vmem:[#allocation5 + $0x1a0] sm:$0xff]  ;;  %v96_v30 = vld [vmem:[#allocation5 + $0x1a8] sm:$0xff]  ;;  %v684_v33 = vpack.c.bf16 %v48_v28, %v47_v27  ;;  %v65_v35 = vld [vmem:[#allocation5 + $0xb0] sm:$0xff] }
  0x2e   :  { %711 = vmatprep.subr.bf16.mxu1 %v710_v21  ;;  %v79_v31 = vld [vmem:[#allocation5 + $0x120] sm:$0xff]  ;;  %v80_v32 = vld [vmem:[#allocation5 + $0x128] sm:$0xff]  ;;  %681 = vmatpush3.bf16.msra.mxu0 %v680_v17  ;;  %v714_v34 = vpack.c.bf16 %v96_v30, %v95_v29  ;;  %v66_v36 = vld [vmem:[#allocation5 + $0xb8] sm:$0xff] }
  0x2f   :  { %v49_v37 = vld [vmem:[#allocation5 + $0x30] sm:$0xff]  ;;  %683 = vmatprep.subr.bf16.mxu0 %v682_v26  ;;  %v716_v38 = vpack.c.bf16 %v80_v32, %v79_v31  ;;  %v686_v39 = vpack.c.bf16 %v66_v36, %v65_v35  ;;  %v50_v40 = vld [vmem:[#allocation5 + $0x38] sm:$0xff]  ;;  %v67_v46 = vld [vmem:[#allocation5 + $0xc0] sm:$0xff] }
  0x30   :  { %713 = vmatpush3.bf16.msra.mxu1 %v712_v25  ;;  %v97_v41 = vld [vmem:[#allocation5 + $0x1b0] sm:$0xff]  ;;  %v98_v42 = vld [vmem:[#allocation5 + $0x1b8] sm:$0xff]  ;;  %v68_v50 = vld [vmem:[#allocation5 + $0xc8] sm:$0xff]  ;;  %v688_v51 = vpack.c.bf16 %v50_v40, %v49_v37 }
  0x31   :  { %715 = vmatprep.subr.bf16.mxu1 %v714_v34  ;;  %v718_v43 = vpack.c.bf16 %v98_v42, %v97_v41  ;;  %v81_v44 = vld [vmem:[#allocation5 + $0x130] sm:$0xff]  ;;  %v82_v45 = vld [vmem:[#allocation5 + $0x138] sm:$0xff]  ;;  %v99_v52 = vld [vmem:[#allocation5 + $0x1c0] sm:$0xff]  ;;  %v690_v55 = vpack.c.bf16 %v68_v50, %v67_v46 }
  0x32   :  { %685 = vmatpush3.bf16.msra.mxu0 %v684_v33  ;;  %v100_v53 = vld [vmem:[#allocation5 + $0x1c8] sm:$0xff]  ;;  %v720_v54 = vpack.c.bf16 %v82_v45, %v81_v44  ;;  %v51_v56 = vld [vmem:[#allocation5 + $0x40] sm:$0xff]  ;;  %v69_v61 = vld [vmem:[#allocation5 + $0xd0] sm:$0xff] }
  0x33   :  { %687 = vmatprep.subr.bf16.mxu0 %v686_v39  ;;  %v52_v57 = vld [vmem:[#allocation5 + $0x48] sm:$0xff]  ;;  %v83_v58 = vld [vmem:[#allocation5 + $0x140] sm:$0xff]  ;;  %v722_v59 = vpack.c.bf16 %v100_v53, %v99_v52  ;;  %v70_v62 = vld [vmem:[#allocation5 + $0xd8] sm:$0xff] }
  0x34   :  { %717 = vmatpush3.bf16.msra.mxu1 %v716_v38  ;;  %v84_v60 = vld [vmem:[#allocation5 + $0x148] sm:$0xff]  ;;  %v101_v1 = vld [vmem:[#allocation5 + $0x1d0] sm:$0xff]  ;;  %v102_v2 = vld [vmem:[#allocation5 + $0x1d8] sm:$0xff]  ;;  %v692_v3 = vpack.c.bf16 %v52_v57, %v51_v56  ;;  %v694_v5 = vpack.c.bf16 %v70_v62, %v69_v61 }
  0x35   :  { %719 = vmatprep.subr.bf16.mxu1 %v718_v43  ;;  %v724_v4 = vpack.c.bf16 %v84_v60, %v83_v58  ;;  %v53_v6 = vld [vmem:[#allocation5 + $0x50] sm:$0xff]  ;;  %v54_v7 = vld [vmem:[#allocation5 + $0x58] sm:$0xff]  ;;  %v726_v9 = vpack.c.bf16 %v102_v2, %v101_v1  ;;  %v71_v11 = vld [vmem:[#allocation5 + $0xe0] sm:$0xff] }
  0x36   :  { %689 = vmatpush3.bf16.msra.mxu0 %v688_v51  ;;  %v85_v8 = vld [vmem:[#allocation5 + $0x150] sm:$0xff]  ;;  %v86_v10 = vld [vmem:[#allocation5 + $0x158] sm:$0xff]  ;;  %v72_v12 = vld [vmem:[#allocation5 + $0xe8] sm:$0xff]  ;;  %v696_v16 = vpack.c.bf16 %v54_v7, %v53_v6 }
  0x37   :  { %691 = vmatprep.subr.bf16.mxu0 %v690_v55  ;;  %v103_v14 = vld [vmem:[#allocation5 + $0x1e0] sm:$0xff]  ;;  %v104_v15 = vld [vmem:[#allocation5 + $0x1e8] sm:$0xff]  ;;  %v728_v18 = vpack.c.bf16 %v86_v10, %v85_v8  ;;  %v698_v19 = vpack.c.bf16 %v72_v12, %v71_v11  ;;  %v41_v22 = vld [vmem:[#allocation2] sm:$0xff] }
  0x38   :  { %721 = vmatpush3.bf16.msra.mxu1 %v720_v54  ;;  %v55_v17 = vld [vmem:[#allocation5 + $0x60] sm:$0xff]  ;;  %v56_v20 = vld [vmem:[#allocation5 + $0x68] sm:$0xff]  ;;  %v730_v23 = vpack.c.bf16 %v104_v15, %v103_v14  ;;  %v73_v25 = vld [vmem:[#allocation5 + $0xf0] sm:$0xff]  ;;  %v187_v27 = vrot.slane %v41_v22, %v943_v13  ;;  %v180_v28 = vcombine.high %v41_v22, %v41_v22 }
  0x39   :  { %723 = vmatprep.subr.bf16.mxu1 %v722_v59  ;;  %v87_v21 = vld [vmem:[#allocation5 + $0x160] sm:$0xff]  ;;  %v88_v24 = vld [vmem:[#allocation5 + $0x168] sm:$0xff]  ;;  %v74_v26 = vld [vmem:[#allocation5 + $0xf8] sm:$0xff]  ;;  %v700_v31 = vpack.c.bf16 %v56_v20, %v55_v17 }
  0x3a   :  { %693 = vmatpush3.bf16.msra.mxu0 %v692_v3  ;;  %v105_v29 = vld [vmem:[#allocation5 + $0x1f0] sm:$0xff]  ;;  %v106_v30 = vld [vmem:[#allocation5 + $0x1f8] sm:$0xff]  ;;  %v195_v32 = vcombine.high %v187_v27, %v187_v27  ;;  %v194_v33 = vrot.slane %v180_v28, %v943_v13  ;;  %v732_v34 = vpack.c.bf16 %v88_v24, %v87_v21  ;;  %v702_v35 = vpack.c.bf16 %v74_v26, %v73_v25  ;;  %v123_v41 = vld [vmem:[#allocation5 + $0x280] sm:$0xff] }
  0x3b   :  { %695 = vmatprep.subr.bf16.mxu0 %v694_v5  ;;  %v57_v36 = vld [vmem:[#allocation5 + $0x70] sm:$0xff]  ;;  %v58_v37 = vld [vmem:[#allocation5 + $0x78] sm:$0xff]  ;;  %v734_v39 = vpack.c.bf16 %v106_v30, %v105_v29  ;;  %v124_v42 = vld [vmem:[#allocation5 + $0x288] sm:$0xff] }
  0x3c   :  { %725 = vmatpush3.bf16.msra.mxu1 %v724_v4  ;;  %v89_v38 = vld [vmem:[#allocation5 + $0x170] sm:$0xff]  ;;  %v90_v40 = vld [vmem:[#allocation5 + $0x178] sm:$0xff]  ;;  %286 = vmatprep.mubr.f32.mxu0 %v195_v32  ;;  %v196_v43 = vcombine.high %v194_v33, %v194_v33  ;;  %v155_v44 = vld [vmem:[#allocation5 + $0x380] sm:$0xff]  ;;  %v704_v46 = vpack.c.bf16 %v58_v37, %v57_v36  ;;  %v738_v48 = vpack.c.bf16 %v124_v42, %v123_v41 }
  0x3d   :  { %727 = vmatprep.subr.bf16.mxu1 %v726_v9  ;;  %v156_v45 = vld [vmem:[#allocation5 + $0x388] sm:$0xff]  ;;  %v736_v47 = vpack.c.bf16 %v90_v40, %v89_v38  ;;  %v107_v49 = vld [vmem:[#allocation5 + $0x200] sm:$0xff]  ;;  %v125_v54 = vld [vmem:[#allocation5 + $0x290] sm:$0xff] }
  0x3e   :  { %697 = vmatpush3.bf16.msra.mxu0 %v696_v16  ;;  %356 = vmatprep.mubr.f32.mxu1 %v196_v43  ;;  %v108_v50 = vld [vmem:[#allocation5 + $0x208] sm:$0xff]  ;;  %v139_v51 = vld [vmem:[#allocation5 + $0x300] sm:$0xff]  ;;  %v770_v52 = vpack.c.bf16 %v156_v45, %v155_v44  ;;  %v126_v55 = vld [vmem:[#allocation5 + $0x298] sm:$0xff] }
  0x3f   :  { %699 = vmatprep.subr.bf16.mxu0 %v698_v19  ;;  %v140_v53 = vld [vmem:[#allocation5 + $0x308] sm:$0xff]  ;;  %v157_v56 = vld [vmem:[#allocation5 + $0x390] sm:$0xff]  ;;  %v158_v57 = vld [vmem:[#allocation5 + $0x398] sm:$0xff]  ;;  %v740_v58 = vpack.c.bf16 %v108_v50, %v107_v49  ;;  %v742_v60 = vpack.c.bf16 %v126_v55, %v125_v54 }
  0x40   :  { %729 = vmatpush3.bf16.msra.mxu1 %v728_v18  ;;  %v772_v59 = vpack.c.bf16 %v140_v53, %v139_v51  ;;  %v109_v61 = vld [vmem:[#allocation5 + $0x210] sm:$0xff]  ;;  %v110_v62 = vld [vmem:[#allocation5 + $0x218] sm:$0xff]  ;;  %v774_v0 = vpack.c.bf16 %v158_v57, %v157_v56  ;;  %v127_v2 = vld [vmem:[#allocation5 + $0x2a0] sm:$0xff] }
  0x41   :  { %731 = vmatprep.subr.bf16.mxu1 %v730_v23  ;;  %v141_v63 = vld [vmem:[#allocation5 + $0x310] sm:$0xff]  ;;  %v142_v1 = vld [vmem:[#allocation5 + $0x318] sm:$0xff]  ;;  %v128_v3 = vld [vmem:[#allocation5 + $0x2a8] sm:$0xff]  ;;  %v744_v6 = vpack.c.bf16 %v110_v62, %v109_v61 }
  0x42   :  { %701 = vmatpush3.bf16.msra.mxu0 %v700_v31  ;;  %v159_v4 = vld [vmem:[#allocation5 + $0x3a0] sm:$0xff]  ;;  %v160_v5 = vld [vmem:[#allocation5 + $0x3a8] sm:$0xff]  ;;  %v776_v7 = vpack.c.bf16 %v142_v1, %v141_v63  ;;  %v746_v8 = vpack.c.bf16 %v128_v3, %v127_v2  ;;  %v129_v15 = vld [vmem:[#allocation5 + $0x2b0] sm:$0xff] }
  0x43   :  { %703 = vmatprep.subr.bf16.mxu0 %v702_v35  ;;  %v111_v9 = vld [vmem:[#allocation5 + $0x220] sm:$0xff]  ;;  %v112_v10 = vld [vmem:[#allocation5 + $0x228] sm:$0xff]  ;;  %v778_v12 = vpack.c.bf16 %v160_v5, %v159_v4  ;;  %v130_v16 = vld [vmem:[#allocation5 + $0x2b8] sm:$0xff] }
  0x44   :  { %733 = vmatpush3.bf16.msra.mxu1 %v732_v34  ;;  %v143_v11 = vld [vmem:[#allocation5 + $0x320] sm:$0xff]  ;;  %v144_v14 = vld [vmem:[#allocation5 + $0x328] sm:$0xff]  ;;  %v161_v17 = vld [vmem:[#allocation5 + $0x3b0] sm:$0xff]  ;;  %v748_v19 = vpack.c.bf16 %v112_v10, %v111_v9  ;;  %v750_v21 = vpack.c.bf16 %v130_v16, %v129_v15 }
  0x45   :  { %735 = vmatprep.subr.bf16.mxu1 %v734_v39  ;;  %v162_v18 = vld [vmem:[#allocation5 + $0x3b8] sm:$0xff]  ;;  %v780_v20 = vpack.c.bf16 %v144_v14, %v143_v11  ;;  %v113_v22 = vld [vmem:[#allocation5 + $0x230] sm:$0xff]  ;;  %v132_v28 = vld [vmem:[#allocation5 + $0x2c8] sm:$0xff] }
  0x46   :  { %705 = vmatpush3.bf16.msra.mxu0 %v704_v46  ;;  %v114_v23 = vld [vmem:[#allocation5 + $0x238] sm:$0xff]  ;;  %v145_v24 = vld [vmem:[#allocation5 + $0x330] sm:$0xff]  ;;  %v782_v25 = vpack.c.bf16 %v162_v18, %v161_v17  ;;  %v163_v29 = vld [vmem:[#allocation5 + $0x3c0] sm:$0xff] }
  0x47   :  { %739 = vmatprep.subr.bf16.mxu0 %v738_v48  ;;  %v146_v26 = vld [vmem:[#allocation5 + $0x338] sm:$0xff]  ;;  %v164_v30 = vld [vmem:[#allocation5 + $0x3c8] sm:$0xff]  ;;  %v752_v32 = vpack.c.bf16 %v114_v23, %v113_v22  ;;  %v115_v37 = vld [vmem:[#allocation5 + $0x240] sm:$0xff] }
  0x48   :  { %737 = vmatpush3.bf16.msra.mxu1 %v736_v47  ;;  %v42_v31 = vld [vmem:[#allocation2 + $0x8] sm:$0xff]  ;;  %v784_v35 = vpack.c.bf16 %v146_v26, %v145_v24  ;;  %v116_v38 = vld [vmem:[#allocation5 + $0x248] sm:$0xff]  ;;  %v147_v39 = vld [vmem:[#allocation5 + $0x340] sm:$0xff]  ;;  %v786_v40 = vpack.c.bf16 %v164_v30, %v163_v29 }
  0x49   :  { %771 = vmatprep.subr.bf16.mxu1 %v770_v52  ;;  %287 = vmatmul.mubr.f32.vlgmr.msra.gmra.mrb[0].mxu0 %v187_v27  ;;  %v131_v27 = vld [vmem:[#allocation5 + $0x2c0] sm:$0xff]  ;;  %v197_v34 = vcombine.high %v42_v31, %v42_v31  ;;  %v148_v41 = vld [vmem:[#allocation5 + $0x348] sm:$0xff]  ;;  %v133_v42 = vld [vmem:[#allocation5 + $0x2d0] sm:$0xff]  ;;  %v756_v48 = vpack.c.bf16 %v116_v38, %v115_v37 }
  0x4a   :  { %741 = vmatpush3.bf16.msra.mxu0 %v740_v58  ;;  %v754_v36 = vpack.c.bf16 %v132_v28, %v131_v27  ;;  %v134_v43 = vld [vmem:[#allocation5 + $0x2d8] sm:$0xff]  ;;  %v165_v46 = vld [vmem:[#allocation5 + $0x3d0] sm:$0xff]  ;;  %v788_v50 = vpack.c.bf16 %v148_v41, %v147_v39  ;;  %v135_v57 = vld [vmem:[#allocation5 + $0x2e0] sm:$0xff] }
  0x4b   :  { %357 = vmatmul.mubr.f32.vlgmr.msra.gmra.mrb[0].mxu1 %v194_v33  ;;  %743 = vmatprep.subr.bf16.mxu0 %v742_v60  ;;  %v948_v33 = vrot.slane %v42_v31, %v943_v13  ;;  %v211_v45 = vrot.slane %v197_v34, %v943_v13  ;;  %v166_v47 = vld [vmem:[#allocation5 + $0x3d8] sm:$0xff]  ;;  %v758_v51 = vpack.c.bf16 %v134_v43, %v133_v42  ;;  %v117_v52 = vld [vmem:[#allocation5 + $0x250] sm:$0xff]  ;;  %v136_v58 = vld [vmem:[#allocation5 + $0x2e8] sm:$0xff] }
  0x4c   :  { %773 = vmatpush3.bf16.msra.mxu1 %v772_v59  ;;  %v118_v53 = vld [vmem:[#allocation5 + $0x258] sm:$0xff]  ;;  %v149_v54 = vld [vmem:[#allocation5 + $0x350] sm:$0xff]  ;;  %v790_v55 = vpack.c.bf16 %v166_v47, %v165_v46  ;;  %v167_v13 = vld [vmem:[#allocation5 + $0x3e0] sm:$0xff]  ;;  %v762_v62 = vpack.c.bf16 %v136_v58, %v135_v57 }
  0x4d   :  { %775 = vmatprep.subr.bf16.mxu1 %v774_v0  ;;  %v212_v44 = vcombine.high %v948_v33, %v948_v33  ;;  %v213_v49 = vcombine.high %v211_v45, %v211_v45  ;;  %v150_v56 = vld [vmem:[#allocation5 + $0x358] sm:$0xff]  ;;  %v168_v59 = vld [vmem:[#allocation5 + $0x3e8] sm:$0xff]  ;;  %v760_v60 = vpack.c.bf16 %v118_v53, %v117_v52  ;;  %v119_v63 = vld [vmem:[#allocation5 + $0x260] sm:$0xff] }
  0x4e   :  { %745 = vmatpush3.bf16.msra.mxu0 %v744_v6  ;;  %v792_v61 = vpack.c.bf16 %v150_v56, %v149_v54  ;;  %v120_v0 = vld [vmem:[#allocation5 + $0x268] sm:$0xff]  ;;  %v151_v1 = vld [vmem:[#allocation5 + $0x360] sm:$0xff]  ;;  %v794_v2 = vpack.c.bf16 %v168_v59, %v167_v13  ;;  %v137_v4 = vld [vmem:[#allocation5 + $0x2f0] sm:$0xff] }
  0x4f   :  { %747 = vmatprep.subr.bf16.mxu0 %v746_v8  ;;  %426 = vmatprep.mubr.f32.mxu0 %v212_v44  ;;  %v152_v3 = vld [vmem:[#allocation5 + $0x368] sm:$0xff]  ;;  %v138_v5 = vld [vmem:[#allocation5 + $0x2f8] sm:$0xff]  ;;  %v169_v6 = vld [vmem:[#allocation5 + $0x3f0] sm:$0xff]  ;;  %v764_v8 = vpack.c.bf16 %v120_v0, %v119_v63 }
  0x50   :  { %777 = vmatpush3.bf16.msra.mxu1 %v776_v7  ;;  %496 = vmatprep.mubr.f32.mxu1 %v213_v49  ;;  %v170_v7 = vld [vmem:[#allocation5 + $0x3f8] sm:$0xff]  ;;  %v796_v9 = vpack.c.bf16 %v152_v3, %v151_v1  ;;  %v766_v10 = vpack.c.bf16 %v138_v5, %v137_v4  ;;  %v121_v11 = vld [vmem:[#allocation5 + $0x270] sm:$0xff] }
  0x51   :  { %779 = vmatprep.subr.bf16.mxu1 %v778_v12  ;;  %v122_v12 = vld [vmem:[#allocation5 + $0x278] sm:$0xff]  ;;  %v798_v14 = vpack.c.bf16 %v170_v7, %v169_v6  ;;  %v153_v15 = vld [vmem:[#allocation5 + $0x370] sm:$0xff] }
  0x52   :  { %749 = vmatpush3.bf16.msra.mxu0 %v748_v19  ;;  %v154_v16 = vld [vmem:[#allocation5 + $0x378] sm:$0xff]  ;;  %v768_v17 = vpack.c.bf16 %v122_v12, %v121_v11 }
  0x53   :  { %751 = vmatprep.subr.bf16.mxu0 %v750_v21  ;;  %v800_v18 = vpack.c.bf16 %v154_v16, %v153_v15 }
  0x54   :  { %781 = vmatpush3.bf16.msra.mxu1 %v780_v20  ;;  %v533_v20 = vld [vmem:[%s971_s2] ss:$0 sm:$0xff]  ;;  %s891_s2 = smov [#allocation7]  }
  0x55   :  { %783 = vmatprep.subr.bf16.mxu1 %v782_v25  ;;  %s523_s11 = sshll.u32 %s891_s2, 4  ;;  %s524_s11 = int_to_ptr.vmem [resolvable:$true] %s523_s11 }
  0x56   :  { %753 = vmatpush3.bf16.msra.mxu0 %v752_v32  ;;  %s858_s12 = scalar_lea.vmem %s524_s11, 32  ;;  %p863_p3 = scmp.lt.s32.totalorder %s524_s11, %s524_s11 }
  0x57   :  { %755 = vmatprep.subr.bf16.mxu0 %v754_v36  ;;  %p859_p2 = scmp.ne.s32.totalorder %s524_s11, %s858_s12  ;;  %p864_p4 = scmp.lt.s32.totalorder %s858_s12, %s858_s12 }
  0x58   :  { %785 = vmatpush3.bf16.msra.mxu1 %v784_v35 }
  0x59   :  { %787 = vmatprep.subr.bf16.mxu1 %v786_v40  ;;  %p865_p5 = por %p864_p4, %p863_p3 }
  0x5a   :  { %757 = vmatpush3.bf16.msra.mxu0 %v756_v48 }
  0x5b   :  { %759 = vmatprep.subr.bf16.mxu0 %v758_v51  ;;  %p866_p6 = pnand %p865_p5, %p859_p2 }
  0x5c   :  { %789 = vmatpush3.bf16.msra.mxu1 %v788_v50 }
  0x5d   :  { %791 = vmatprep.subr.bf16.mxu1 %v790_v55 }
  0x5e   :  { %761 = vmatpush3.bf16.msra.mxu0 %v760_v60 }
  0x5f   :  { %763 = vmatprep.subr.bf16.mxu0 %v762_v62 }
  0x60   :  { %793 = vmatpush3.bf16.msra.mxu1 %v792_v61 }
  0x61   :  { %795 = vmatprep.subr.bf16.mxu1 %v794_v2 }
  0x62   :  { %765 = vmatpush3.bf16.msra.mxu0 %v764_v8 }
  0x63   :  { %767 = vmatprep.subr.bf16.mxu0 %v766_v10 }
  0x64   :  { %797 = vmatpush3.bf16.msra.mxu1 %v796_v9 }
  0x65   :  { %799 = vmatprep.subr.bf16.mxu1 %v798_v14 }
  0x66   :  { %769 = vmatpush3.bf16.msra.mxu0 %v768_v17 }
  0x68   :  { %801 = vmatpush3.bf16.msra.mxu1 %v800_v18 }
  0x69   :  { %427 = vmatmul.mubr.f32.vlgmr.msra.gmra.mrb[2].mxu0 %v948_v33 }
  0x6b   :  { %497 = vmatmul.mubr.f32.vlgmr.msra.gmra.mrb[2].mxu1 %v211_v45 }
 0x11c   :  { %v566_v19 = vpop.f32.mrb[0].mxu0 }
 0x11d   :  { %v567_v21 = vpop.f32.mrb[1].mxu0 }
 0x11e   :  { %v601_v22 = vpop.f32.mrb[0].mxu1  ;;  %v568_v23 = vadd.f32 %v567_v21, %v566_v19 }
 0x11f   :  { %v602_v24 = vpop.f32.mrb[1].mxu1 }
 0x120   :  { %v603_v25 = vadd.f32 %v602_v24, %v601_v22  ;;  %v289_v26 = vadd.f32 %v568_v23, %v533_v20 }
 0x122   :  { %v359_v27 = vadd.f32 %v603_v25, %v289_v26 }
 0x13c   :  { %v636_v28 = vpop.f32.mrb[2].mxu0 }
 0x13d   :  { %v637_v29 = vpop.f32.mrb[3].mxu0 }
 0x13e   :  { %v671_v30 = vpop.f32.mrb[2].mxu1  ;;  %v638_v31 = vadd.f32 %v637_v29, %v636_v28 }
 0x13f   :  { %v672_v32 = vpop.f32.mrb[3].mxu1 }
 0x140   :  { %v673_v34 = vadd.f32 %v672_v32, %v671_v30  ;;  %v429_v33 = vadd.f32 %v638_v31, %v359_v27 }
 0x142   :  { %v499_v35 = vadd.f32 %v673_v34, %v429_v33 }
 0x144   :  { %v503_v36 = vsel %vm502_vm0, %v499_v35, -inf }
 0x145   :  { %504 = vmax.xlane.f32.xlu0 %v503_v36 }
 0x1d2   :  { %v505_v37 = vpop.xlane.xlu0 %504 }
 0x1d3   :  { %v506_v38 = vsub.f32 %v499_v35, %v505_v37 }
 0x1d5   :  { %v507_v39 = vmul.f32 1.442695, %v506_v38 }
 0x1d7   :  { %810 = vpow2.f32 %v507_v39 }
 0x1e1   :  { %v811_v40 = vpop.eup %810 }
 0x1e2   :  { %v509_v41 = vsel %vm502_vm0, %v811_v40, 0.0 }
 0x1e3   :  { %510 = vadd.xlane.f32.xlu0 %v509_v41 }
 0x270   :  { %v511_v42 = vpop.xlane.xlu0 %510 }
 0x271   :  { %812 = vlog2.f32 %v511_v42 }
 0x27b   :  { %v813_v43 = vpop.eup %812 }
 0x27c   :  { %v513_v44 = vmul.f32 0.6931472, %v813_v43 }
 0x27e   :  { %v514_v45 = vsub.f32 %v506_v38, %v513_v44 }
 0x280   :  { %516 = vst.msk [vmem:[#allocation7] sm:$0x3] %vm515_vm1, %v514_v45 }
 0x281   :  { %869 = shalt.err (!%p866_p6)
}
 0x282   :  { %s870_s15 = scalar_lea.hbm %s972_s3, 32 }
 0x283   :  { %p871_p7 = scmp.ne.s32.totalorder %s972_s3, %s870_s15  ;;  %p874_p8 = scmp.lt.u32.totalorder %s870_s15, %s972_s3 }
 0x285   :  { %p876_p9 = pnand %p874_p8, %p871_p7 }
 0x287   :  { %879 = shalt.err (!%p876_p9)
}
 0x288   :  { %526 = dma.vmem_to_hbm [thread:$0]  %s524_s11, 32, %s972_s3, [#allocation4]  }
 0x289   :  { %884 = dma.done.wait [#allocation4], 32  }
 0x28a   :  { %885 = vsyncadd [#allocation4], 4294967264 }
 0x28b   :  { %530 = vsyncpa [#allocation3], 1 }
 0x28c   :  { %531 = vsyncpa [#allocation6], 1 }
 0x28d   :  { %532 = vsyncpa [#allocation4], 1 }

</bundles_post_ra>
